<compile_context>
chip_gen: v6e
topology: v6e:2x2x1
jax: 0.10.0
libtpu: 0.0.40
codegen_flags: <defaults>
</compile_context>

<pallas_src>
import jax
import jax.numpy as jnp
from jax import lax
from jax.experimental import pallas as pl
from jax.experimental.pallas import tpu as pltpu

# ---------------- model dims (small, consistent with the module) ----------------
BATCH = 8            # N
WVF_DIM = 90         # waveform input length (docstring: (N, 90))
WVF_PAD = 128        # lane-padded waveform length
REP_DIM = 32         # encoder.dim_rep (stand-in; see TODO below)
LATENT_DIM = 10      # latent_dim default
LATENT_PAD = 128     # lane-padded latent width
TEMPERATURE = 0.5
INV_SQRT_T = 1.0 / (TEMPERATURE ** 0.5)   # trace-time constant (temperature is static)
LN_EPS = 1e-5
L2_EPS = 1e-12
MASK_VAL = 1_000_000.0


# ---------------------------------------------------------------------------
# Fused Pallas kernel:
#   encoder (linear+GELU stand-in) -> LayerNorm -> linear projection -> L2 norm
#   (1/sqrt(t) folded in) -> one Gram matmul -> SimCLR contrastive loss
#   (similarity_adjust=False branch).
# ---------------------------------------------------------------------------
def simclr_fused_kernel(views_ref, w_enc_ref, w_proj_ref, packed_ref, loss_ref):
    # Packed small params: row 0 = b_enc, row 1 = gamma, row 2 = beta (lanes 0..REP_DIM-1),
    # row 3 = b_proj (lanes 0..LATENT_DIM-1, rest exactly zero).
    b_enc = packed_ref[0:1, :REP_DIM]                    # (1, REP_DIM)
    gamma = packed_ref[1:2, :REP_DIM]                    # (1, REP_DIM)
    beta = packed_ref[2:3, :REP_DIM]                     # (1, REP_DIM)
    b_proj = packed_ref[3:4, :]                          # (1, LATENT_PAD), zero past LATENT_DIM

    views = views_ref[...]                               # (2B, WVF_PAD), lanes >= WVF_DIM are 0

    # Encoder. TODO(synk): SingleWVFEncoder source not provided; deterministic
    # linear + GELU stand-in with dim_rep = REP_DIM.
    rep = jnp.dot(views, w_enc_ref[...], preferred_element_type=jnp.float32) + b_enc
    rep = jax.nn.gelu(rep)                               # (2B, REP_DIM)

    # LinearProjector with apply_layer_norm=True: LayerNorm -> Linear.
    mu = jnp.mean(rep, axis=-1, keepdims=True)
    var = jnp.mean((rep - mu) ** 2, axis=-1, keepdims=True)
    xn = (rep - mu) * lax.rsqrt(var + LN_EPS)
    xn = xn * gamma + beta
    e = jnp.dot(xn, w_proj_ref[...], preferred_element_type=jnp.float32) + b_proj  # (2B, LATENT_PAD)

    # L2 normalization fused with the temperature fold: each embedding row is scaled by
    # (1/||e||) * (1/sqrt(t)), so every Gram entry below is already divided by t.
    # Padded lanes of e are exactly zero -> they contribute nothing to the norm.
    inv_norm = lax.rsqrt(jnp.sum(e * e, axis=-1, keepdims=True) + L2_EPS)
    emb = e * (inv_norm * INV_SQRT_T)                    # (2B, LATENT_PAD)

    # ONE Gram matmul on the stacked embedding (contract last dims; no explicit transpose).
    G = lax.dot_general(emb, emb, (((1,), (1,)), ((), ())),
                        preferred_element_type=jnp.float32)          # (2B, 2B), pre-scaled 1/t

    B = BATCH
    row = lax.broadcasted_iota(jnp.int32, (2 * B, 2 * B), 0)
    col = lax.broadcasted_iota(jnp.int32, (2 * B, 2 * B), 1)
    eye2 = (row == col).astype(jnp.float32)                          # self-similarity mask
    pair = (jnp.abs(row - col) == B).astype(jnp.float32)             # positive-pair mask

    # For row i<B:  x-side logits are a permutation of G[i, :] with (i,i) masked, target G[i, i+B].
    # For row i>=B: y-side logits are a permutation of G[i, :] with (i,i) masked, target G[i, i-B].
    # LSE is permutation-invariant, so the whole loss reduces to one pass over masked G.
    logits = G - eye2 * MASK_VAL                                     # (2B, 2B)
    pos = jnp.sum(G * pair, axis=-1, keepdims=True)                  # (2B, 1) correct-class logit

    m = jnp.max(logits, axis=-1, keepdims=True)
    lse = jnp.log(jnp.sum(jnp.exp(logits - m), axis=-1, keepdims=True)) + m
    per_row = lse - pos                                              # (2B, 1) per-row CE

    # (x_loss + y_loss) / 2 == mean of the 2B per-row CE terms divided by 2? No:
    # x_loss = mean over B rows, y_loss = mean over B rows, so (x+y)/2 = sum(per_row) / (2B).
    loss_ref[0] = jnp.sum(per_row) * (1.0 / (2.0 * B))


# ---------------------------------------------------------------------------
# Wrapper-side (one-time) packing / padding helpers
# ---------------------------------------------------------------------------
def pack_small_params(b_enc, gamma, beta, b_proj):
    """Pack the tiny per-feature params into one (4, LATENT_PAD) array (one DMA)."""
    packed = jnp.zeros((4, LATENT_PAD), jnp.float32)
    packed = packed.at[0, :REP_DIM].set(b_enc.reshape(-1))
    packed = packed.at[1, :REP_DIM].set(gamma.reshape(-1))
    packed = packed.at[2, :REP_DIM].set(beta.reshape(-1))
    packed = packed.at[3, :LATENT_DIM].set(b_proj.reshape(-1))
    return packed


def prepare_inputs(view1, view2, w_enc, w_proj):
    """Pre-stack the two views and zero-pad lane-ragged dims (done outside the hot kernel)."""
    views = jnp.concatenate([view1, view2], axis=0)                       # (2B, WVF_DIM)
    views = jnp.pad(views, ((0, 0), (0, WVF_PAD - WVF_DIM)))              # (2B, WVF_PAD)
    w_enc_p = jnp.pad(w_enc, ((0, WVF_PAD - WVF_DIM), (0, 0)))            # (WVF_PAD, REP_DIM)
    w_proj_p = jnp.pad(w_proj, ((0, 0), (0, LATENT_PAD - LATENT_DIM)))    # (REP_DIM, LATENT_PAD)
    return views, w_enc_p, w_proj_p


def simclr_forward_pallas(views_padded, w_enc_padded, w_proj_padded, packed_params):
    vmem = pl.BlockSpec(memory_space=pltpu.MemorySpace.VMEM)
    smem = pl.BlockSpec(memory_space=pltpu.MemorySpace.SMEM)
    # TODO(synk): if this loss is evaluated for many independent (micro)batches per step,
    # add a leading "parallel" grid axis (2 TCs on v7x) / fuse the backward to amortize the
    # pallas_call launch cost; a single B=8 forward needs no grid.
    out = pl.pallas_call(
        simclr_fused_kernel,
        out_shape=jax.ShapeDtypeStruct((1,), jnp.float32),
        in_specs=[vmem, vmem, vmem, vmem],
        out_specs=smem,
    )(views_padded, w_enc_padded, w_proj_padded, packed_params)
    return out[0]


# ---------------------------------------------------------------------------
# Plain-JAX reference for correctness checking (mirrors the PyTorch module)
# ---------------------------------------------------------------------------
def reference_forward(view1, view2, raw):
    def proj(v):
        rep = jax.nn.gelu(v @ raw["w_enc"] + raw["b_enc"])
        mu = rep.mean(-1, keepdims=True)
        var = ((rep - mu) ** 2).mean(-1, keepdims=True)
        xn = (rep - mu) / jnp.sqrt(var + LN_EPS)
        xn = xn * raw["gamma"] + raw["beta"]
        e = xn @ raw["w_proj"] + raw["b_proj"]
        return e / jnp.linalg.norm(e, axis=1, keepdims=True)

    X = proj(view1)
    Y = proj(view2)
    t = TEMPERATURE
    B = X.shape[0]
    eye = jnp.eye(B, dtype=jnp.float32)
    xy = X @ Y.T / t
    yx = Y @ X.T / t
    xx = X @ X.T / t - eye * MASK_VAL
    yy = Y @ Y.T / t - eye * MASK_VAL
    labels = jnp.arange(B)

    def ce(logits):
        logp = jax.nn.log_softmax(logits, axis=-1)
        return -jnp.mean(logp[jnp.arange(B), labels])

    return (ce(jnp.concatenate([xy, xx], 1)) + ce(jnp.concatenate([yx, yy], 1))) * 0.5


# ---------------------------------------------------------------------------
if __name__ == "__main__":
    key = jax.random.PRNGKey(0)
    k1, k2, k3, k4, k5 = jax.random.split(key, 5)

    view1 = jax.random.normal(k1, (BATCH, WVF_DIM), dtype=jnp.float32)
    view2 = jax.random.normal(k2, (BATCH, WVF_DIM), dtype=jnp.float32)

    raw = {
        "w_enc": jax.random.normal(k3, (WVF_DIM, REP_DIM), jnp.float32) * 0.05,
        "b_enc": jnp.zeros((1, REP_DIM), jnp.float32),
        "gamma": jnp.ones((1, REP_DIM), jnp.float32),
        "beta": jnp.zeros((1, REP_DIM), jnp.float32),
        "w_proj": jax.random.normal(k4, (REP_DIM, LATENT_DIM), jnp.float32) * 0.1,
        "b_proj": jax.random.normal(k5, (1, LATENT_DIM), jnp.float32) * 0.01,
    }

    # One-time wrapper-side packing / padding (outside the hot path).
    packed = pack_small_params(raw["b_enc"], raw["gamma"], raw["beta"], raw["b_proj"])
    views_p, w_enc_p, w_proj_p = prepare_inputs(view1, view2, raw["w_enc"], raw["w_proj"])

    loss = jax.block_until_ready(
        simclr_forward_pallas(views_p, w_enc_p, w_proj_p, packed))
    ref = jax.block_until_ready(reference_forward(view1, view2, raw))

    assert jnp.allclose(loss, ref, rtol=1e-4, atol=1e-4), (loss, ref)
    print("KERNEL_OK")
</pallas_src>

<mosaic_0001>
module attributes {stable_mosaic.version = 11 : i64} {
  func.func @simclr_fused_kernel(%arg0: memref<16x128xf32, #tpu.memory_space<vmem>>, %arg1: memref<128x32xf32, #tpu.memory_space<vmem>>, %arg2: memref<32x128xf32, #tpu.memory_space<vmem>>, %arg3: memref<4x128xf32, #tpu.memory_space<vmem>>, %arg4: memref<1xf32, #tpu.memory_space<smem>>) attributes {dimension_semantics = [], scalar_prefetch = 0 : i64, scratch_operands = 0 : i64, tpu.core_type = #tpu.core_type<tc>} {
    %c0 = arith.constant 0 : index
    %c0_0 = arith.constant 0 : index
    %0 = vector.load %arg3[%c0, %c0_0] : memref<4x128xf32, #tpu.memory_space<vmem>>, vector<1x32xf32>
    %c1 = arith.constant 1 : index
    %c0_1 = arith.constant 0 : index
    %1 = vector.load %arg3[%c1, %c0_1] : memref<4x128xf32, #tpu.memory_space<vmem>>, vector<1x32xf32>
    %c2 = arith.constant 2 : index
    %c0_2 = arith.constant 0 : index
    %2 = vector.load %arg3[%c2, %c0_2] : memref<4x128xf32, #tpu.memory_space<vmem>>, vector<1x32xf32>
    %c3 = arith.constant 3 : index
    %c0_3 = arith.constant 0 : index
    %3 = vector.load %arg3[%c3, %c0_3] : memref<4x128xf32, #tpu.memory_space<vmem>>, vector<1x128xf32>
    %c0_4 = arith.constant 0 : index
    %c0_5 = arith.constant 0 : index
    %4 = vector.load %arg0[%c0_4, %c0_5] : memref<16x128xf32, #tpu.memory_space<vmem>>, vector<16x128xf32>
    %c0_6 = arith.constant 0 : index
    %c0_7 = arith.constant 0 : index
    %5 = vector.load %arg1[%c0_6, %c0_7] : memref<128x32xf32, #tpu.memory_space<vmem>>, vector<128x32xf32>
    %cst = arith.constant dense<0.000000e+00> : vector<16x32xf32>
    %6 = tpu.matmul %4, %5, %cst {dimension_numbers = #tpu.dot_dimension_numbers<[1], [0], [0], [1], [0, 0, 1, 1], [], []>} : vector<16x128xf32>, vector<128x32xf32>, vector<16x32xf32> -> vector<16x32xf32>
    %7 = vector.broadcast %0 : vector<1x32xf32> to vector<16x32xf32>
    %8 = arith.addf %6, %7 : vector<16x32xf32>
    %9 = arith.mulf %8, %8 : vector<16x32xf32>
    %10 = arith.mulf %8, %9 : vector<16x32xf32>
    %cst_8 = arith.constant 4.471500e-02 : f32
    %11 = vector.broadcast %cst_8 : f32 to vector<16x32xf32>
    %12 = arith.mulf %11, %10 : vector<16x32xf32>
    %13 = arith.addf %8, %12 : vector<16x32xf32>
    %cst_9 = arith.constant 0.797884583 : f32
    %14 = vector.broadcast %cst_9 : f32 to vector<16x32xf32>
    %15 = arith.mulf %14, %13 : vector<16x32xf32>
    %16 = math.tanh %15 : vector<16x32xf32>
    %cst_10 = arith.constant 1.000000e+00 : f32
    %17 = vector.broadcast %cst_10 : f32 to vector<16x32xf32>
    %18 = arith.addf %17, %16 : vector<16x32xf32>
    %cst_11 = arith.constant 5.000000e-01 : f32
    %19 = vector.broadcast %cst_11 : f32 to vector<16x32xf32>
    %20 = arith.mulf %19, %18 : vector<16x32xf32>
    %21 = arith.mulf %8, %20 : vector<16x32xf32>
    %cst_12 = arith.constant dense<0.000000e+00> : vector<16xf32>
    %22 = vector.multi_reduction <add>, %21, %cst_12 [1] : vector<16x32xf32> to vector<16xf32>
    %23 = vector.shape_cast %22 : vector<16xf32> to vector<16x1xf32>
    %cst_13 = arith.constant 3.200000e+01 : f32
    %24 = vector.broadcast %cst_13 : f32 to vector<16x1xf32>
    %25 = arith.divf %23, %24 : vector<16x1xf32>
    %26 = vector.broadcast %25 : vector<16x1xf32> to vector<16x32xf32>
    %27 = arith.subf %21, %26 : vector<16x32xf32>
    %28 = arith.mulf %27, %27 : vector<16x32xf32>
    %cst_14 = arith.constant dense<0.000000e+00> : vector<16xf32>
    %29 = vector.multi_reduction <add>, %28, %cst_14 [1] : vector<16x32xf32> to vector<16xf32>
    %30 = vector.shape_cast %29 : vector<16xf32> to vector<16x1xf32>
    %cst_15 = arith.constant 3.200000e+01 : f32
    %31 = vector.broadcast %cst_15 : f32 to vector<16x1xf32>
    %32 = arith.divf %30, %31 : vector<16x1xf32>
    %33 = vector.broadcast %25 : vector<16x1xf32> to vector<16x32xf32>
    %34 = arith.subf %21, %33 : vector<16x32xf32>
    %cst_16 = arith.constant 9.99999974E-6 : f32
    %35 = vector.broadcast %cst_16 : f32 to vector<16x1xf32>
    %36 = arith.addf %32, %35 : vector<16x1xf32>
    %37 = math.rsqrt %36 : vector<16x1xf32>
    %38 = vector.broadcast %37 : vector<16x1xf32> to vector<16x32xf32>
    %39 = arith.mulf %34, %38 : vector<16x32xf32>
    %40 = vector.broadcast %1 : vector<1x32xf32> to vector<16x32xf32>
    %41 = arith.mulf %39, %40 : vector<16x32xf32>
    %42 = vector.broadcast %2 : vector<1x32xf32> to vector<16x32xf32>
    %43 = arith.addf %41, %42 : vector<16x32xf32>
    %c0_17 = arith.constant 0 : index
    %c0_18 = arith.constant 0 : index
    %44 = vector.load %arg2[%c0_17, %c0_18] : memref<32x128xf32, #tpu.memory_space<vmem>>, vector<32x128xf32>
    %cst_19 = arith.constant dense<0.000000e+00> : vector<16x128xf32>
    %45 = tpu.matmul %43, %44, %cst_19 {dimension_numbers = #tpu.dot_dimension_numbers<[1], [0], [0], [1], [0, 0, 1, 1], [], []>} : vector<16x32xf32>, vector<32x128xf32>, vector<16x128xf32> -> vector<16x128xf32>
    %46 = vector.broadcast %3 : vector<1x128xf32> to vector<16x128xf32>
    %47 = arith.addf %45, %46 : vector<16x128xf32>
    %48 = arith.mulf %47, %47 : vector<16x128xf32>
    %cst_20 = arith.constant dense<0.000000e+00> : vector<16xf32>
    %49 = vector.multi_reduction <add>, %48, %cst_20 [1] : vector<16x128xf32> to vector<16xf32>
    %50 = vector.shape_cast %49 : vector<16xf32> to vector<16x1xf32>
    %cst_21 = arith.constant 9.99999996E-13 : f32
    %51 = vector.broadcast %cst_21 : f32 to vector<16x1xf32>
    %52 = arith.addf %50, %51 : vector<16x1xf32>
    %53 = math.rsqrt %52 : vector<16x1xf32>
    %cst_22 = arith.constant 1.41421354 : f32
    %54 = vector.broadcast %cst_22 : f32 to vector<16x1xf32>
    %55 = arith.mulf %53, %54 : vector<16x1xf32>
    %56 = vector.broadcast %55 : vector<16x1xf32> to vector<16x128xf32>
    %57 = arith.mulf %47, %56 : vector<16x128xf32>
    %cst_23 = arith.constant dense<0.000000e+00> : vector<16x16xf32>
    %58 = tpu.matmul %57, %57, %cst_23 {dimension_numbers = #tpu.dot_dimension_numbers<[1], [1], [0], [0], [0, 0, 1, 0], [], []>} : vector<16x128xf32>, vector<16x128xf32>, vector<16x16xf32> -> vector<16x16xf32>
    %59 = tpu.iota {dimensions = array<i32: 0>} : vector<16x16xi32>
    %60 = tpu.iota {dimensions = array<i32: 1>} : vector<16x16xi32>
    %61 = arith.cmpi eq, %59, %60 : vector<16x16xi32>
    %62 = arith.extui %61 : vector<16x16xi1> to vector<16x16xi32>
    %63 = arith.sitofp %62 : vector<16x16xi32> to vector<16x16xf32>
    %64 = arith.subi %59, %60 : vector<16x16xi32>
    %65 = math.absi %64 : vector<16x16xi32>
    %c8_i32 = arith.constant 8 : i32
    %66 = vector.broadcast %c8_i32 : i32 to vector<16x16xi32>
    %67 = arith.cmpi eq, %65, %66 : vector<16x16xi32>
    %68 = arith.extui %67 : vector<16x16xi1> to vector<16x16xi32>
    %69 = arith.sitofp %68 : vector<16x16xi32> to vector<16x16xf32>
    %cst_24 = arith.constant 1.000000e+06 : f32
    %70 = vector.broadcast %cst_24 : f32 to vector<16x16xf32>
    %71 = arith.mulf %63, %70 : vector<16x16xf32>
    %72 = arith.subf %58, %71 : vector<16x16xf32>
    %73 = arith.mulf %58, %69 : vector<16x16xf32>
    %cst_25 = arith.constant dense<0.000000e+00> : vector<16xf32>
    %74 = vector.multi_reduction <add>, %73, %cst_25 [1] : vector<16x16xf32> to vector<16xf32>
    %75 = vector.shape_cast %74 : vector<16xf32> to vector<16x1xf32>
    %cst_26 = arith.constant dense<0xFF800000> : vector<16xf32>
    %76 = vector.multi_reduction <maximumf>, %72, %cst_26 [1] : vector<16x16xf32> to vector<16xf32>
    %77 = vector.shape_cast %76 : vector<16xf32> to vector<16x1xf32>
    %78 = vector.broadcast %77 : vector<16x1xf32> to vector<16x16xf32>
    %79 = arith.subf %72, %78 : vector<16x16xf32>
    %80 = math.exp %79 : vector<16x16xf32>
    %cst_27 = arith.constant dense<0.000000e+00> : vector<16xf32>
    %81 = vector.multi_reduction <add>, %80, %cst_27 [1] : vector<16x16xf32> to vector<16xf32>
    %82 = vector.shape_cast %81 : vector<16xf32> to vector<16x1xf32>
    %83 = math.log %82 : vector<16x1xf32>
    %84 = arith.addf %83, %77 : vector<16x1xf32>
    %85 = arith.subf %84, %75 : vector<16x1xf32>
    %86 = vector.shape_cast %85 : vector<16x1xf32> to vector<1x16x1xf32>
    %cst_28 = arith.constant dense<0.000000e+00> : vector<1xf32>
    %87 = vector.multi_reduction <add>, %86, %cst_28 [1, 2] : vector<1x16x1xf32> to vector<1xf32>
    %88 = vector.shape_cast %87 : vector<1xf32> to vector<1x1x1xf32>
    %89 = vector.extract %88[0, 0, 0] : f32 from vector<1x1x1xf32>
    %cst_29 = arith.constant 6.250000e-02 : f32
    %90 = arith.mulf %89, %cst_29 : f32
    %c0_30 = arith.constant 0 : index
    %91 = memref.load %arg4[%c0_30] : memref<1xf32, #tpu.memory_space<smem>>
    memref.store %90, %arg4[%c0_30] : memref<1xf32, #tpu.memory_space<smem>>
    return
  }
}

</mosaic_0001>

<bundles_post_ra>
// kernel: tpu_custom_call.1
= control target key start
LH: loop header
LB: loop body
LE: loop exit
PB: predicated region body
PF: predicated region fallthrough
CT: control target
= control target key end

     0   :  { %s695_s0 = inlined_call_operand.vmem [shape: f32[16,128], index: 0, kind: input, shape index: {}]   ;;  %s696_s1 = inlined_call_operand.vmem [shape: f32[128,32], index: 1, kind: input, shape index: {}]   ;;  %s697_s2 = inlined_call_operand.vmem [shape: f32[32,128], index: 2, kind: input, shape index: {}]   ;;  %s698_s3 = inlined_call_operand.vmem [shape: f32[4,128], index: 3, kind: input, shape index: {}]   ;;  %s699_s4 = inlined_call_operand.hbm [shape: f32[1], index: 4, kind: output, shape index: {}]  }
   0x1   :  { %v39_v0 = vld [vmem:[%s696_s1 + $0x78] sm:$0xff]  ;;  %v38_v1 = vld [vmem:[%s696_s1 + $0x70] sm:$0xff]  ;;  %v37_v2 = vld [vmem:[%s696_s1 + $0x68] sm:$0xff] }
   0x2   :  { %488 = vmatprep.subr.mxu0 %v39_v0  ;;  %v36_v3 = vld [vmem:[%s696_s1 + $0x60] sm:$0xff]  ;;  %v35_v5 = vld [vmem:[%s696_s1 + $0x58] sm:$0xff] }
   0x3   :  { %489 = vmatpush3.msra.mxu0 %v39_v0  ;;  %v22_v4 = vld [vmem:[%s695_s0] sm:$0xff] }
   0x4   :  { %490 = vmatprep.subr.mxu0 %v38_v1  ;;  %520 = vmatprep.mubr.f32.mxu0 %v22_v4 }
   0x5   :  { %491 = vmatpush3.msra.mxu0 %v38_v1 }
   0x6   :  { %492 = vmatprep.subr.mxu0 %v37_v2 }
   0x7   :  { %493 = vmatpush3.msra.mxu0 %v37_v2 }
   0x8   :  { %9 = vsyncpa [#allocation3], 0  ;;  %494 = vmatprep.subr.mxu0 %v36_v3  ;;  %v34_v6 = vld [vmem:[%s696_s1 + $0x50] sm:$0xff]  ;;  %v33_v7 = vld [vmem:[%s696_s1 + $0x48] sm:$0xff]  ;;  %vm137_vm0 = vcmask 261120   ;;  %vm386_vm5 = vcmask 130048  }
   0x9   :  { %495 = vmatpush3.msra.mxu0 %v36_v3  ;;  %v32_v8 = vld [vmem:[%s696_s1 + $0x40] sm:$0xff]  ;;  %v31_v9 = vld [vmem:[%s696_s1 + $0x38] sm:$0xff]  ;;  %v30_v10 = vld [vmem:[%s696_s1 + $0x30] sm:$0xff]  ;;  %vm419_vm6 = vcmask 7168   ;;  %s576_s13 = smov [#allocation2]  }
   0xa   :  { %496 = vmatprep.subr.mxu0 %v35_v5  ;;  %v29_v11 = vld [vmem:[%s696_s1 + $0x28] sm:$0xff]  ;;  %v28_v12 = vld [vmem:[%s696_s1 + $0x20] sm:$0xff]  ;;  %v27_v13 = vld [vmem:[%s696_s1 + $0x18] sm:$0xff] }
   0xb   :  { %497 = vmatpush3.msra.mxu0 %v35_v5  ;;  %v26_v14 = vld [vmem:[%s696_s1 + $0x10] sm:$0xff]  ;;  %v25_v15 = vld [vmem:[%s696_s1 + $0x8] sm:$0xff]  ;;  %v24_v16 = vld [vmem:[%s696_s1] sm:$0xff] }
   0xc   :  { %498 = vmatprep.subr.mxu0 %v34_v6  ;;  %v23_v17 = vld [vmem:[%s695_s0 + $0x8] sm:$0xff]  ;;  %v448_v18 = vld [vmem:[%s698_s3] ss:$0 sm:$0xff]  ;;  %v180_v53 = vld [vmem:[%s697_s2 + $0x18] sm:$0xff] }
   0xd   :  { %499 = vmatpush3.msra.mxu0 %v34_v6  ;;  %v179_v54 = vld [vmem:[%s697_s2 + $0x10] sm:$0xff]  ;;  %523 = vmatprep.subr.mxu1 %v180_v53  ;;  %v178_v55 = vld [vmem:[%s697_s2 + $0x8] sm:$0xff]  ;;  %v177_v56 = vld [vmem:[%s697_s2] sm:$0xff] }
   0xe   :  { %500 = vmatprep.subr.mxu0 %v33_v7  ;;  %524 = vmatpush3.msra.mxu1 %v180_v53  ;;  %v449_v0 = vld [vmem:[%s698_s3 + $0x1] ss:$0 sm:$0xff]  ;;  %v450_v2 = vld [vmem:[%s698_s3 + $0x2] ss:$0 sm:$0xff] }
   0xf   :  { %501 = vmatpush3.msra.mxu0 %v33_v7  ;;  %525 = vmatprep.subr.mxu1 %v179_v54 }
  0x10   :  { %502 = vmatprep.subr.mxu0 %v32_v8  ;;  %526 = vmatpush3.msra.mxu1 %v179_v54 }
  0x11   :  { %503 = vmatpush3.msra.mxu0 %v32_v8  ;;  %527 = vmatprep.subr.mxu1 %v178_v55 }
  0x12   :  { %504 = vmatprep.subr.mxu0 %v31_v9  ;;  %528 = vmatpush3.msra.mxu1 %v178_v55 }
  0x13   :  { %505 = vmatpush3.msra.mxu0 %v31_v9  ;;  %529 = vmatprep.subr.mxu1 %v177_v56  ;;  %v451_v9 = vld [vmem:[%s698_s3 + $0x3] ss:$0 sm:$0xff] }
  0x14   :  { %506 = vmatprep.subr.mxu0 %v30_v10  ;;  %530 = vmatpush3.msra.mxu1 %v177_v56 }
  0x15   :  { %507 = vmatpush3.msra.mxu0 %v30_v10 }
  0x16   :  { %508 = vmatprep.subr.mxu0 %v29_v11 }
  0x17   :  { %509 = vmatpush3.msra.mxu0 %v29_v11 }
  0x18   :  { %510 = vmatprep.subr.mxu0 %v28_v12 }
  0x19   :  { %511 = vmatpush3.msra.mxu0 %v28_v12 }
  0x1a   :  { %512 = vmatprep.subr.mxu0 %v27_v13 }
  0x1b   :  { %513 = vmatpush3.msra.mxu0 %v27_v13 }
  0x1c   :  { %514 = vmatprep.subr.mxu0 %v26_v14 }
  0x1d   :  { %515 = vmatpush3.msra.mxu0 %v26_v14 }
  0x1e   :  { %516 = vmatprep.subr.mxu0 %v25_v15 }
  0x1f   :  { %517 = vmatpush3.msra.mxu0 %v25_v15 }
  0x20   :  { %518 = vmatprep.subr.mxu0 %v24_v16 }
  0x21   :  { %519 = vmatpush3.msra.mxu0 %v24_v16 }
  0x22   :  { %521 = vmatmul.mubr.f32.vlgmr.msra.gmra.mxu0 %v23_v17 }
  0xe2   :  { %v522_v19 = vpop.f32.mrf.mxu0 }
  0xe3   :  { %v116_v20 = vadd.f32 %v522_v19, %v448_v18 }
  0xe4   :  { %v110_v21 = vpop.f32.mrf.mxu0 }
  0xe5   :  { %v120_v22 = vmul.f32 %v116_v20, %v116_v20  ;;  %v111_v23 = vadd.f32 %v448_v18, %v110_v21 }
  0xe7   :  { %v122_v24 = vmul.f32 %v120_v22, %v116_v20  ;;  %v119_v25 = vmul.f32 %v111_v23, %v111_v23 }
  0xe9   :  { %v124_v26 = vmul.f32 0.044715, %v122_v24  ;;  %v121_v27 = vmul.f32 %v119_v25, %v111_v23 }
  0xeb   :  { %v126_v28 = vadd.f32 %v124_v26, %v116_v20  ;;  %v123_v29 = vmul.f32 0.044715, %v121_v27  ;;  %v355_v26 = vlaneseq }
  0xed   :  { %v125_v30 = vadd.f32 %v123_v29, %v111_v23  ;;  %v128_v31 = vmul.f32 0.7978846, %v126_v28  ;;  %v356_v27 = vshrl.u32 %v355_v26, 7  ;;  %v359_v29 = vand.u32 127, %v355_v26 }
  0xef   :  { %v127_v32 = vmul.f32 0.7978846, %v125_v30  ;;  %545 = vtanh.f32 %v128_v31  ;;  %v357_v28 = vadd.s32 8, %v356_v27  ;;  %vm360_vm4 = vcmp.eq.s32.totalorder %v356_v27, %v359_v29 }
  0xf1   :  { %547 = vtanh.f32 %v127_v32  ;;  %v367_v30 = vsub.s32 %v357_v28, %v359_v29  ;;  %v366_v32 = vsub.s32 %v356_v27, %v359_v29  ;;  %vm361_vm3 = vcmp.eq.s32.totalorder %v357_v28, %v359_v29 }
  0xf3   :  { %v372_v31 = vsub.s32 0, %v367_v30 }
  0xfc   :  { %v546_v33 = vpop.eup %545 }
  0xfd   :  { %v132_v34 = vadd.f32 1.0, %v546_v33  ;;  %v457_v33 = vmin.u32 %v372_v31, %v367_v30 }
  0xfe   :  { %v548_v35 = vpop.eup %547 }
  0xff   :  { %v131_v36 = vadd.f32 1.0, %v548_v35  ;;  %v134_v38 = vmul.f32 0.5, %v132_v34  ;;  %v369_v34 = vsub.s32 0, %v366_v32  ;;  %vm375_vm1 = vcmp.eq.s32.totalorder %v457_v33, 8 }
 0x101   :  { %v133_v37 = vmul.f32 0.5, %v131_v36  ;;  %v136_v41 = vmul.f32 %v134_v38, %v116_v20  ;;  %v456_v35 = vmin.u32 %v369_v34, %v366_v32  ;;  %v575_v36 = vmov 0.0  }
 0x103   :  { %v135_v39 = vmul.f32 %v133_v37, %v111_v23  ;;  %v141_v42 = vsel %vm137_vm0, %v136_v41, 0.0  ;;  %v459_v37 = vsel %vm375_vm1, 1.0, %v575_v36  ;;  %vm374_vm2 = vcmp.eq.s32.totalorder %v456_v35, 8 }
 0x104   :  { %v458_v38 = vsel %vm374_vm2, 1.0, %v575_v36 }
 0x105   :  { %v138_v40 = vsel %vm137_vm0, %v135_v39, 0.0 }
 0x106   :  { %139 = vadd.xlane.f32.xlu0 %v138_v40  ;;  %v454_v40 = vsel %vm360_vm4, 1.0, %v575_v36 }
 0x10a   :  { %142 = vadd.xlane.f32.xlu0 %v141_v42  ;;  %v380_v42 = vmul.f32 1000000.0, %v454_v40 }
 0x18f   :  { %v140_v43 = vpop.xlane.xlu0 %139 }
 0x190   :  { %v145_v44 = vmul.f32 0.03125, %v140_v43 }
 0x192   :  { %v147_v45 = vsub.f32 %v135_v39, %v145_v44  ;;  %v455_v39 = vsel %vm361_vm3, 1.0, %v575_v36 }
 0x193   :  { %v143_v46 = vpop.xlane.xlu0 %142 }
 0x194   :  { %v146_v47 = vmul.f32 0.03125, %v143_v46  ;;  %v149_v48 = vmul.f32 %v147_v45, %v147_v45 }
 0x196   :  { %v148_v49 = vsub.f32 %v136_v41, %v146_v47  ;;  %v151_v50 = vsel %vm137_vm0, %v149_v48, 0.0  ;;  %v381_v41 = vmul.f32 1000000.0, %v455_v39 }
 0x197   :  { %152 = vadd.xlane.f32.xlu1 %v151_v50 }
 0x198   :  { %v150_v51 = vmul.f32 %v148_v49, %v148_v49 }
 0x19a   :  { %v154_v52 = vsel %vm137_vm0, %v150_v51, 0.0 }
 0x19b   :  { %155 = vadd.xlane.f32.xlu1 %v154_v52 }
 0x220   :  { %v153_v57 = vpop.xlane.xlu1 %152 }
 0x221   :  { %v157_v58 = vmul.f32 0.03125, %v153_v57 }
 0x223   :  { %v159_v59 = vadd.f32 1e-05, %v157_v58 }
 0x224   :  { %v156_v60 = vpop.xlane.xlu1 %155 }
 0x225   :  { %549 = vrsqrt.f32 %v159_v59  ;;  %v158_v61 = vmul.f32 0.03125, %v156_v60 }
 0x227   :  { %v160_v62 = vadd.f32 1e-05, %v158_v61 }
 0x229   :  { %551 = vrsqrt.f32 %v160_v62 }
 0x232   :  { %v550_v63 = vpop.eup %549 }
 0x233   :  { %v163_v1 = vmul.f32 %v550_v63, %v147_v45 }
 0x235   :  { %v169_v3 = vmul.f32 %v449_v0, %v163_v1 }
 0x236   :  { %v552_v4 = vpop.eup %551 }
 0x237   :  { %v164_v5 = vmul.f32 %v552_v4, %v148_v49  ;;  %v175_v6 = vadd.f32 %v450_v2, %v169_v3 }
 0x239   :  { %v170_v7 = vmul.f32 %v449_v0, %v164_v5  ;;  %531 = vmatprep.mubr.msk.f32.mxu1 %vm137_vm0, %v175_v6 }
 0x23b   :  { %v176_v8 = vadd.f32 %v450_v2, %v170_v7 }
 0x23d   :  { %532 = vmatmul.mubr.msk.f32.vlgmr.msra.gmra.mxu1 %vm137_vm0, %v176_v8 }
 0x2fd   :  { %v533_v10 = vpop.f32.mrf.mxu1 }
 0x2fe   :  { %v263_v11 = vadd.f32 %v533_v10, %v451_v9 }
 0x2ff   :  { %v257_v12 = vpop.f32.mrf.mxu1 }
 0x300   :  { %v258_v13 = vadd.f32 %v451_v9, %v257_v12  ;;  %v267_v14 = vmul.f32 %v263_v11, %v263_v11 }
 0x302   :  { %270 = vadd.xlane.f32.xlu0 %v267_v14  ;;  %v266_v15 = vmul.f32 %v258_v13, %v258_v13 }
 0x304   :  { %268 = vadd.xlane.f32.xlu1 %v266_v15 }
 0x38b   :  { %v271_v16 = vpop.xlane.xlu0 %270 }
 0x38c   :  { %v273_v17 = vadd.f32 1e-12, %v271_v16 }
 0x38d   :  { %v269_v18 = vpop.xlane.xlu1 %268 }
 0x38e   :  { %553 = vrsqrt.f32 %v273_v17  ;;  %v272_v19 = vadd.f32 1e-12, %v269_v18 }
 0x390   :  { %555 = vrsqrt.f32 %v272_v19 }
 0x39b   :  { %v554_v20 = vpop.eup %553 }
 0x39c   :  { %v277_v21 = vmul.f32 1.4142135, %v554_v20 }
 0x39d   :  { %v556_v22 = vpop.eup %555 }
 0x39e   :  { %v276_v23 = vmul.f32 1.4142135, %v556_v22  ;;  %v279_v24 = vmul.f32 %v277_v21, %v263_v11 }
 0x3a0   :  { %534 = vmatprep.subr.mxu1 %v279_v24  ;;  %v278_v25 = vmul.f32 %v276_v23, %v258_v13 }
 0x3a1   :  { %535 = vmatpush3.xpose.msra.mxu1 %v279_v24 }
 0x3a2   :  { %536 = vmatprep.subr.mxu1 %v278_v25  ;;  %538 = vmatprep.mubr.f32.mxu1 %v278_v25 }
 0x3a5   :  { %537 = vmatpush3.xpose.msra.mxu1 %v278_v25 }
 0x3a8   :  { %539 = vmatmul.mubr.f32.vlgmr.msra.gmra.mxu1 %v279_v24 }
 0x468   :  { %v540_v43 = vpop.f32.mrf.mxu1 }
 0x469   :  { %v383_v44 = vsub.f32 %v540_v43, %v381_v41  ;;  %v385_v45 = vmul.f32 %v540_v43, %v459_v37 }
 0x46a   :  { %v346_v46 = vpop.f32.mrf.mxu1 }
 0x46b   :  { %v382_v47 = vsub.f32 %v346_v46, %v380_v42  ;;  %v384_v48 = vmul.f32 %v458_v38, %v346_v46  ;;  %v396_v49 = vsel %vm386_vm5, %v383_v44, -inf  ;;  %v390_v61 = vsel %vm386_vm5, %v385_v45, 0.0 }
 0x46c   :  { %397 = vmax.xlane.f32.xlu1 %v396_v49 }
 0x46d   :  { %v393_v50 = vsel %vm386_vm5, %v382_v47, -inf  ;;  %v387_v62 = vsel %vm386_vm5, %v384_v48, 0.0 }
 0x46e   :  { %394 = vmax.xlane.f32.xlu0 %v393_v50 }
 0x4f5   :  { %v398_v51 = vpop.xlane.xlu1 %397 }
 0x4f6   :  { %v400_v52 = vsub.f32 %v383_v44, %v398_v51 }
 0x4f7   :  { %v395_v53 = vpop.xlane.xlu0 %394 }
 0x4f8   :  { %v403_v54 = vmul.f32 1.442695, %v400_v52  ;;  %v399_v55 = vsub.f32 %v382_v47, %v395_v53 }
 0x4fa   :  { %557 = vpow2.f32 %v403_v54  ;;  %v401_v56 = vmul.f32 1.442695, %v399_v55 }
 0x4fc   :  { %559 = vpow2.f32 %v401_v56 }
 0x507   :  { %v558_v57 = vpop.eup %557 }
 0x508   :  { %v408_v58 = vsel %vm386_vm5, %v558_v57, 0.0 }
 0x509   :  { %v560_v59 = vpop.eup %559  ;;  %409 = vadd.xlane.f32.xlu1 %v408_v58 }
 0x50a   :  { %v405_v60 = vsel %vm386_vm5, %v560_v59, 0.0 }
 0x50b   :  { %406 = vadd.xlane.f32.xlu0 %v405_v60 }
 0x50d   :  { %391 = vadd.xlane.f32.xlu1 %v390_v61 }
 0x50f   :  { %388 = vadd.xlane.f32.xlu0 %v387_v62 }
 0x592   :  { %v410_v63 = vpop.xlane.xlu1 %409 }
 0x593   :  { %561 = vlog2.f32 %v410_v63 }
 0x594   :  { %v407_v0 = vpop.xlane.xlu0 %406 }
 0x595   :  { %563 = vlog2.f32 %v407_v0 }
 0x596   :  { %v392_v6 = vpop.xlane.xlu1 %391 }
 0x598   :  { %v389_v9 = vpop.xlane.xlu0 %388 }
 0x5a0   :  { %v562_v1 = vpop.eup %561 }
 0x5a1   :  { %v414_v2 = vmul.f32 0.6931472, %v562_v1 }
 0x5a2   :  { %v564_v3 = vpop.eup %563 }
 0x5a3   :  { %v412_v4 = vmul.f32 0.6931472, %v564_v3  ;;  %v416_v5 = vadd.f32 %v414_v2, %v398_v51 }
 0x5a5   :  { %v418_v7 = vsub.f32 %v416_v5, %v392_v6  ;;  %v415_v8 = vadd.f32 %v412_v4, %v395_v53 }
 0x5a7   :  { %v417_v10 = vsub.f32 %v415_v8, %v389_v9  ;;  %v421_v12 = vsel %vm419_vm6, %v418_v7, 0.0 }
 0x5a9   :  { %v420_v11 = vsel %vm419_vm6, %v417_v10, 0.0 }
 0x5aa   :  { %v422_v13 = vadd.f32 %v421_v12, %v420_v11 }
 0x5ac   :  { %423 = vadd.xlane.f32.xlu0 %v422_v13 }
 0x635   :  { %v424_v14 = vpop.xlane.xlu0 %423 }
 0x636   :  { %v425_v15 = vrot.slane %v424_v14, 4 }
 0x638   :  { %v426_v16 = vadd.f32 %v425_v15, %v424_v14 }
 0x63a   :  { %v427_v17 = vrot.slane %v426_v16, 2 }
 0x63c   :  { %v428_v18 = vadd.f32 %v427_v17, %v426_v16 }
 0x63e   :  { %v429_v19 = vrot.slane %v428_v18, 1 }
 0x640   :  { %v430_v20 = vadd.f32 %v429_v19, %v428_v18 }
 0x642   :  { %541 = vpush %v430_v20 }
 0x673   :  { %s542_s3 = spop %541 }
 0x674   :  { %s432_s12 = smul.f32 0.0625, %s542_s3 }
 0x676   :  { %434 = sst [smem:[#allocation2]] %s432_s12 }
 0x677   :  { %442 = dma.smem_to_hbm %s576_s13, 16, %s699_s4, [#allocation3]  }
 0x678   :  { %573 = dma.done.wait [#allocation3], 16  }
 0x679   :  { %574 = vsyncadd [#allocation3], 4294967280 }
 0x67a   :  { %446 = sfence }
 0x67b   :  { %447 = vsyncpa [#allocation3], 1 }

</bundles_post_ra>
